<compile_context>
chip_gen: v7x
topology: tpu7x:2x2x1
jax: 0.10.0
libtpu: 0.0.40
codegen_flags: <defaults>
</compile_context>

<pallas_src>
import functools

import jax
import jax.numpy as jnp
from jax.experimental import pallas as pl
from jax.experimental.pallas import tpu as pltpu


def _vat_kernel(x_ref, d_ref, wt_ref, w_ref, b_ref, o_ref, *, xi, eps, it):
    # Lane-dense channels-first blocks:
    #   x_ref / d_ref / o_ref : (1, Cin, S)   one batch element, S = H*W on lanes
    #   wt_ref : (Cout, Cin)   decoder (1x1 conv) weight, transposed
    #   w_ref  : (Cin, Cout)   decoder weight
    #   b_ref  : (Cout, 1)     decoder bias as a column
    x = x_ref[0]                      # (Cin, S), f32
    d = d_ref[0]                      # (Cin, S)
    Wt = wt_ref[...]                  # (Cout, Cin)
    Wm = w_ref[...]                   # (Cin, Cout)
    b_col = b_ref[...]                # (Cout, 1)
    cin = x.shape[0]
    cout = Wt.shape[0]

    def fwd_proj(v):
        # Wt @ v -> (Cout, S) as `cin` unrolled outer-product FMAs (VPU, no MXU)
        acc = Wt[:, 0:1] * v[0:1, :]
        for ci in range(1, cin):
            acc = acc + Wt[:, ci:ci + 1] * v[ci:ci + 1, :]
        return acc

    def bwd_proj(g):
        # W @ g -> (Cin, S) as `cout` unrolled outer-product FMAs
        acc = Wm[:, 0:1] * g[0:1, :]
        for co in range(1, cout):
            acc = acc + Wm[:, co:co + 1] * g[co:co + 1, :]
        return acc

    def softmax_ch(z):
        # softmax over the channel (sublane) axis of (Cout, S)
        m = jnp.max(z, axis=0, keepdims=True)                 # (1, S)
        e = jnp.exp(z - m)                                    # (Cout, S)
        s = jnp.sum(e, axis=0, keepdims=True)                 # (1, S)
        return e * pl.reciprocal(s, approx=True)

    def l2_normalize(v):
        # per-sample norm over all non-batch dims; matches torch (+1e-8)
        nrm = jnp.sqrt(jnp.sum(v * v, keepdims=True))         # (1, 1)
        return v * pl.reciprocal(nrm + 1e-8, approx=True)

    # pred = softmax(decoder(x)); decoder(x) computed once and reused (linearity)
    logits_x = fwd_proj(x) + b_col                            # (Cout, S)
    p = softmax_ch(logits_x)

    # initial random direction, l2-normalized per sample
    d = l2_normalize(d)

    # power iteration(s); `it` is a static Python int
    for _ in range(it):
        # decoder(x + xi*d) = decoder(x) + xi * (Wt @ d)   (linear decoder)
        logits_hat = logits_x + xi * fwd_proj(d)
        q = softmax_ch(logits_hat)
        # grad of KL(p||q)/B wrt d is (xi/B) * W @ (q - p); the positive scalars
        # xi, 1/B are annihilated by the immediate l2_normalize, so drop them.
        d = l2_normalize(bwd_proj(q - p))

    o_ref[0] = x + eps * d


def vat_decoder_forward(x_nchw, d_nchw, W, bias, *, xi=0.1, eps=10.0, it=1):
    """VATDecoder.forward(x, decoder) with decoder == 1x1 conv (W, bias)."""
    B, C, H, Wsp = x_nchw.shape
    S = H * Wsp
    Cout = W.shape[1]

    # NCHW is already channels-first: a pure reshape gives the lane-dense
    # (B, C, S) kernel layout -- no HBM transposes on input or output.
    x = x_nchw.reshape(B, C, S)
    d = d_nchw.reshape(B, C, S)
    Wt = jnp.transpose(W)                 # (Cout, Cin), tiny
    b_col = bias.reshape(Cout, 1)

    kernel = functools.partial(_vat_kernel, xi=float(xi), eps=float(eps), it=int(it))

    # TODO(synk): for production-sized S*C, add an S-tile grid axis with a
    # two-pass per-sample l2-norm so blocks fit v7x's 64 MiB VMEM.
    out = pl.pallas_call(
        kernel,
        out_shape=jax.ShapeDtypeStruct((B, C, S), x.dtype),
        grid=(B,),
        in_specs=[
            pl.BlockSpec((1, C, S), lambda b: (b, 0, 0)),     # x
            pl.BlockSpec((1, C, S), lambda b: (b, 0, 0)),     # noise d
            pl.BlockSpec((Cout, C), lambda b: (0, 0)),        # W^T
            pl.BlockSpec((C, Cout), lambda b: (0, 0)),        # W
            pl.BlockSpec((Cout, 1), lambda b: (0, 0)),        # bias column
        ],
        out_specs=pl.BlockSpec((1, C, S), lambda b: (b, 0, 0)),
        compiler_params=pltpu.CompilerParams(dimension_semantics=("parallel",)),
    )(x, d, Wt, W, b_col)

    return out.reshape(B, C, H, Wsp)


if __name__ == "__main__":
    key = jax.random.PRNGKey(0)
    kx, kd, kw, kb = jax.random.split(key, 4)

    B, C, H, Wsp = 2, 4, 16, 16   # x: NCHW
    Cout = 8                      # synthetic decoder output channels

    x = jax.random.normal(kx, (B, C, H, Wsp), dtype=jnp.float32)
    # torch.rand(x.shape).sub(0.5) equivalent (plain-JAX glue; deterministic)
    d0 = jax.random.uniform(kd, (B, C, H, Wsp), dtype=jnp.float32) - 0.5
    # deterministic synthetic decoder params (1x1 conv: Cin -> Cout)
    W = jax.random.normal(kw, (C, Cout), dtype=jnp.float32) * 0.1
    bias = jax.random.normal(kb, (Cout,), dtype=jnp.float32) * 0.01

    # TODO(synk): PyTorch accepts an arbitrary `decoder` module + autograd; here
    # the decoder is fixed to a 1x1 conv so its VJP is expressed analytically.
    out = vat_decoder_forward(x, d0, W, bias, xi=0.1, eps=10.0, it=1)
    out = jax.block_until_ready(out)

    assert out.shape == x.shape and out.dtype == x.dtype
    assert bool(jnp.all(jnp.isfinite(out)))
    print("KERNEL_OK")
</pallas_src>

<mosaic_0001>
module attributes {stable_mosaic.version = 11 : i64} {
  func.func @_vat_kernel(%arg0: i32, %arg1: memref<1x4x256xf32, #tpu.memory_space<vmem>>, %arg2: memref<1x4x256xf32, #tpu.memory_space<vmem>>, %arg3: memref<8x4xf32, #tpu.memory_space<vmem>>, %arg4: memref<4x8xf32, #tpu.memory_space<vmem>>, %arg5: memref<8x1xf32, #tpu.memory_space<vmem>>, %arg6: memref<1x4x256xf32, #tpu.memory_space<vmem>>) attributes {dimension_semantics = [#tpu.dimension_semantics<parallel>], iteration_bounds = array<i64: 2>, scalar_prefetch = 0 : i64, scratch_operands = 0 : i64, tpu.core_type = #tpu.core_type<tc>, window_params = [{transform_indices = @transform_0, window_bounds = array<i64: 1, 4, 256>}, {transform_indices = @transform_1, window_bounds = array<i64: 1, 4, 256>}, {pipeline_mode = #tpu.pipeline_mode<synchronous>, transform_indices = @transform_2, window_bounds = array<i64: 8, 4>}, {pipeline_mode = #tpu.pipeline_mode<synchronous>, transform_indices = @transform_3, window_bounds = array<i64: 4, 8>}, {pipeline_mode = #tpu.pipeline_mode<synchronous>, transform_indices = @transform_4, window_bounds = array<i64: 8, 1>}, {transform_indices = @transform_5, window_bounds = array<i64: 1, 4, 256>}]} {
    %c0 = arith.constant 0 : index
    %c0_0 = arith.constant 0 : index
    %c0_1 = arith.constant 0 : index
    %0 = vector.load %arg1[%c0, %c0_0, %c0_1] : memref<1x4x256xf32, #tpu.memory_space<vmem>>, vector<1x4x256xf32>
    %1 = vector.shape_cast %0 : vector<1x4x256xf32> to vector<4x256xf32>
    %c0_2 = arith.constant 0 : index
    %c0_3 = arith.constant 0 : index
    %c0_4 = arith.constant 0 : index
    %2 = vector.load %arg2[%c0_2, %c0_3, %c0_4] : memref<1x4x256xf32, #tpu.memory_space<vmem>>, vector<1x4x256xf32>
    %3 = vector.shape_cast %2 : vector<1x4x256xf32> to vector<4x256xf32>
    %c0_5 = arith.constant 0 : index
    %c0_6 = arith.constant 0 : index
    %4 = vector.load %arg3[%c0_5, %c0_6] : memref<8x4xf32, #tpu.memory_space<vmem>>, vector<8x4xf32>
    %c0_7 = arith.constant 0 : index
    %c0_8 = arith.constant 0 : index
    %5 = vector.load %arg4[%c0_7, %c0_8] : memref<4x8xf32, #tpu.memory_space<vmem>>, vector<4x8xf32>
    %c0_9 = arith.constant 0 : index
    %c0_10 = arith.constant 0 : index
    %6 = vector.load %arg5[%c0_9, %c0_10] : memref<8x1xf32, #tpu.memory_space<vmem>>, vector<8x1xf32>
    %7 = vector.extract_strided_slice %4 {offsets = [0, 0], sizes = [8, 1], strides = [1, 1]} : vector<8x4xf32> to vector<8x1xf32>
    %8 = vector.extract_strided_slice %1 {offsets = [0, 0], sizes = [1, 256], strides = [1, 1]} : vector<4x256xf32> to vector<1x256xf32>
    %9 = vector.broadcast %7 : vector<8x1xf32> to vector<8x256xf32>
    %10 = vector.broadcast %8 : vector<1x256xf32> to vector<8x256xf32>
    %11 = arith.mulf %9, %10 : vector<8x256xf32>
    %12 = vector.extract_strided_slice %4 {offsets = [0, 1], sizes = [8, 1], strides = [1, 1]} : vector<8x4xf32> to vector<8x1xf32>
    %13 = vector.extract_strided_slice %1 {offsets = [1, 0], sizes = [1, 256], strides = [1, 1]} : vector<4x256xf32> to vector<1x256xf32>
    %14 = vector.broadcast %12 : vector<8x1xf32> to vector<8x256xf32>
    %15 = vector.broadcast %13 : vector<1x256xf32> to vector<8x256xf32>
    %16 = arith.mulf %14, %15 : vector<8x256xf32>
    %17 = arith.addf %11, %16 : vector<8x256xf32>
    %18 = vector.extract_strided_slice %4 {offsets = [0, 2], sizes = [8, 1], strides = [1, 1]} : vector<8x4xf32> to vector<8x1xf32>
    %19 = vector.extract_strided_slice %1 {offsets = [2, 0], sizes = [1, 256], strides = [1, 1]} : vector<4x256xf32> to vector<1x256xf32>
    %20 = vector.broadcast %18 : vector<8x1xf32> to vector<8x256xf32>
    %21 = vector.broadcast %19 : vector<1x256xf32> to vector<8x256xf32>
    %22 = arith.mulf %20, %21 : vector<8x256xf32>
    %23 = arith.addf %17, %22 : vector<8x256xf32>
    %24 = vector.extract_strided_slice %4 {offsets = [0, 3], sizes = [8, 1], strides = [1, 1]} : vector<8x4xf32> to vector<8x1xf32>
    %25 = vector.extract_strided_slice %1 {offsets = [3, 0], sizes = [1, 256], strides = [1, 1]} : vector<4x256xf32> to vector<1x256xf32>
    %26 = vector.broadcast %24 : vector<8x1xf32> to vector<8x256xf32>
    %27 = vector.broadcast %25 : vector<1x256xf32> to vector<8x256xf32>
    %28 = arith.mulf %26, %27 : vector<8x256xf32>
    %29 = arith.addf %23, %28 : vector<8x256xf32>
    %30 = vector.broadcast %6 : vector<8x1xf32> to vector<8x256xf32>
    %31 = arith.addf %29, %30 : vector<8x256xf32>
    %cst = arith.constant dense<0xFF800000> : vector<256xf32>
    %32 = vector.multi_reduction <maximumf>, %31, %cst [0] : vector<8x256xf32> to vector<256xf32>
    %33 = vector.shape_cast %32 : vector<256xf32> to vector<1x256xf32>
    %34 = vector.broadcast %33 : vector<1x256xf32> to vector<8x256xf32>
    %35 = arith.subf %31, %34 : vector<8x256xf32>
    %36 = math.exp %35 : vector<8x256xf32>
    %cst_11 = arith.constant dense<0.000000e+00> : vector<256xf32>
    %37 = vector.multi_reduction <add>, %36, %cst_11 [0] : vector<8x256xf32> to vector<256xf32>
    %38 = vector.shape_cast %37 : vector<256xf32> to vector<1x256xf32>
    %39 = tpu.reciprocal %38 {approx = true} : vector<1x256xf32> -> vector<1x256xf32>
    %40 = vector.broadcast %39 : vector<1x256xf32> to vector<8x256xf32>
    %41 = arith.mulf %36, %40 : vector<8x256xf32>
    %42 = arith.mulf %3, %3 : vector<4x256xf32>
    %43 = vector.shape_cast %42 : vector<4x256xf32> to vector<1x4x256xf32>
    %cst_12 = arith.constant dense<0.000000e+00> : vector<1xf32>
    %44 = vector.multi_reduction <add>, %43, %cst_12 [1, 2] : vector<1x4x256xf32> to vector<1xf32>
    %45 = vector.shape_cast %44 : vector<1xf32> to vector<1x1x1xf32>
    %46 = vector.extract %45[0, 0, 0] : f32 from vector<1x1x1xf32>
    %47 = vector.broadcast %46 : f32 to vector<1x1xf32>
    %48 = math.sqrt %47 : vector<1x1xf32>
    %cst_13 = arith.constant 9.99999993E-9 : f32
    %49 = vector.broadcast %cst_13 : f32 to vector<1x1xf32>
    %50 = arith.addf %48, %49 : vector<1x1xf32>
    %51 = tpu.reciprocal %50 {approx = true} : vector<1x1xf32> -> vector<1x1xf32>
    %52 = vector.broadcast %51 : vector<1x1xf32> to vector<4x256xf32>
    %53 = arith.mulf %3, %52 : vector<4x256xf32>
    %54 = vector.extract_strided_slice %4 {offsets = [0, 0], sizes = [8, 1], strides = [1, 1]} : vector<8x4xf32> to vector<8x1xf32>
    %55 = vector.extract_strided_slice %53 {offsets = [0, 0], sizes = [1, 256], strides = [1, 1]} : vector<4x256xf32> to vector<1x256xf32>
    %56 = vector.broadcast %54 : vector<8x1xf32> to vector<8x256xf32>
    %57 = vector.broadcast %55 : vector<1x256xf32> to vector<8x256xf32>
    %58 = arith.mulf %56, %57 : vector<8x256xf32>
    %59 = vector.extract_strided_slice %4 {offsets = [0, 1], sizes = [8, 1], strides = [1, 1]} : vector<8x4xf32> to vector<8x1xf32>
    %60 = vector.extract_strided_slice %53 {offsets = [1, 0], sizes = [1, 256], strides = [1, 1]} : vector<4x256xf32> to vector<1x256xf32>
    %61 = vector.broadcast %59 : vector<8x1xf32> to vector<8x256xf32>
    %62 = vector.broadcast %60 : vector<1x256xf32> to vector<8x256xf32>
    %63 = arith.mulf %61, %62 : vector<8x256xf32>
    %64 = arith.addf %58, %63 : vector<8x256xf32>
    %65 = vector.extract_strided_slice %4 {offsets = [0, 2], sizes = [8, 1], strides = [1, 1]} : vector<8x4xf32> to vector<8x1xf32>
    %66 = vector.extract_strided_slice %53 {offsets = [2, 0], sizes = [1, 256], strides = [1, 1]} : vector<4x256xf32> to vector<1x256xf32>
    %67 = vector.broadcast %65 : vector<8x1xf32> to vector<8x256xf32>
    %68 = vector.broadcast %66 : vector<1x256xf32> to vector<8x256xf32>
    %69 = arith.mulf %67, %68 : vector<8x256xf32>
    %70 = arith.addf %64, %69 : vector<8x256xf32>
    %71 = vector.extract_strided_slice %4 {offsets = [0, 3], sizes = [8, 1], strides = [1, 1]} : vector<8x4xf32> to vector<8x1xf32>
    %72 = vector.extract_strided_slice %53 {offsets = [3, 0], sizes = [1, 256], strides = [1, 1]} : vector<4x256xf32> to vector<1x256xf32>
    %73 = vector.broadcast %71 : vector<8x1xf32> to vector<8x256xf32>
    %74 = vector.broadcast %72 : vector<1x256xf32> to vector<8x256xf32>
    %75 = arith.mulf %73, %74 : vector<8x256xf32>
    %76 = arith.addf %70, %75 : vector<8x256xf32>
    %cst_14 = arith.constant 1.000000e-01 : f32
    %77 = vector.broadcast %cst_14 : f32 to vector<8x256xf32>
    %78 = arith.mulf %77, %76 : vector<8x256xf32>
    %79 = arith.addf %31, %78 : vector<8x256xf32>
    %cst_15 = arith.constant dense<0xFF800000> : vector<256xf32>
    %80 = vector.multi_reduction <maximumf>, %79, %cst_15 [0] : vector<8x256xf32> to vector<256xf32>
    %81 = vector.shape_cast %80 : vector<256xf32> to vector<1x256xf32>
    %82 = vector.broadcast %81 : vector<1x256xf32> to vector<8x256xf32>
    %83 = arith.subf %79, %82 : vector<8x256xf32>
    %84 = math.exp %83 : vector<8x256xf32>
    %cst_16 = arith.constant dense<0.000000e+00> : vector<256xf32>
    %85 = vector.multi_reduction <add>, %84, %cst_16 [0] : vector<8x256xf32> to vector<256xf32>
    %86 = vector.shape_cast %85 : vector<256xf32> to vector<1x256xf32>
    %87 = tpu.reciprocal %86 {approx = true} : vector<1x256xf32> -> vector<1x256xf32>
    %88 = vector.broadcast %87 : vector<1x256xf32> to vector<8x256xf32>
    %89 = arith.mulf %84, %88 : vector<8x256xf32>
    %90 = arith.subf %89, %41 : vector<8x256xf32>
    %91 = vector.extract_strided_slice %5 {offsets = [0, 0], sizes = [4, 1], strides = [1, 1]} : vector<4x8xf32> to vector<4x1xf32>
    %92 = vector.extract_strided_slice %90 {offsets = [0, 0], sizes = [1, 256], strides = [1, 1]} : vector<8x256xf32> to vector<1x256xf32>
    %93 = vector.broadcast %91 : vector<4x1xf32> to vector<4x256xf32>
    %94 = vector.broadcast %92 : vector<1x256xf32> to vector<4x256xf32>
    %95 = arith.mulf %93, %94 : vector<4x256xf32>
    %96 = vector.extract_strided_slice %5 {offsets = [0, 1], sizes = [4, 1], strides = [1, 1]} : vector<4x8xf32> to vector<4x1xf32>
    %97 = vector.extract_strided_slice %90 {offsets = [1, 0], sizes = [1, 256], strides = [1, 1]} : vector<8x256xf32> to vector<1x256xf32>
    %98 = vector.broadcast %96 : vector<4x1xf32> to vector<4x256xf32>
    %99 = vector.broadcast %97 : vector<1x256xf32> to vector<4x256xf32>
    %100 = arith.mulf %98, %99 : vector<4x256xf32>
    %101 = arith.addf %95, %100 : vector<4x256xf32>
    %102 = vector.extract_strided_slice %5 {offsets = [0, 2], sizes = [4, 1], strides = [1, 1]} : vector<4x8xf32> to vector<4x1xf32>
    %103 = vector.extract_strided_slice %90 {offsets = [2, 0], sizes = [1, 256], strides = [1, 1]} : vector<8x256xf32> to vector<1x256xf32>
    %104 = vector.broadcast %102 : vector<4x1xf32> to vector<4x256xf32>
    %105 = vector.broadcast %103 : vector<1x256xf32> to vector<4x256xf32>
    %106 = arith.mulf %104, %105 : vector<4x256xf32>
    %107 = arith.addf %101, %106 : vector<4x256xf32>
    %108 = vector.extract_strided_slice %5 {offsets = [0, 3], sizes = [4, 1], strides = [1, 1]} : vector<4x8xf32> to vector<4x1xf32>
    %109 = vector.extract_strided_slice %90 {offsets = [3, 0], sizes = [1, 256], strides = [1, 1]} : vector<8x256xf32> to vector<1x256xf32>
    %110 = vector.broadcast %108 : vector<4x1xf32> to vector<4x256xf32>
    %111 = vector.broadcast %109 : vector<1x256xf32> to vector<4x256xf32>
    %112 = arith.mulf %110, %111 : vector<4x256xf32>
    %113 = arith.addf %107, %112 : vector<4x256xf32>
    %114 = vector.extract_strided_slice %5 {offsets = [0, 4], sizes = [4, 1], strides = [1, 1]} : vector<4x8xf32> to vector<4x1xf32>
    %115 = vector.extract_strided_slice %90 {offsets = [4, 0], sizes = [1, 256], strides = [1, 1]} : vector<8x256xf32> to vector<1x256xf32>
    %116 = vector.broadcast %114 : vector<4x1xf32> to vector<4x256xf32>
    %117 = vector.broadcast %115 : vector<1x256xf32> to vector<4x256xf32>
    %118 = arith.mulf %116, %117 : vector<4x256xf32>
    %119 = arith.addf %113, %118 : vector<4x256xf32>
    %120 = vector.extract_strided_slice %5 {offsets = [0, 5], sizes = [4, 1], strides = [1, 1]} : vector<4x8xf32> to vector<4x1xf32>
    %121 = vector.extract_strided_slice %90 {offsets = [5, 0], sizes = [1, 256], strides = [1, 1]} : vector<8x256xf32> to vector<1x256xf32>
    %122 = vector.broadcast %120 : vector<4x1xf32> to vector<4x256xf32>
    %123 = vector.broadcast %121 : vector<1x256xf32> to vector<4x256xf32>
    %124 = arith.mulf %122, %123 : vector<4x256xf32>
    %125 = arith.addf %119, %124 : vector<4x256xf32>
    %126 = vector.extract_strided_slice %5 {offsets = [0, 6], sizes = [4, 1], strides = [1, 1]} : vector<4x8xf32> to vector<4x1xf32>
    %127 = vector.extract_strided_slice %90 {offsets = [6, 0], sizes = [1, 256], strides = [1, 1]} : vector<8x256xf32> to vector<1x256xf32>
    %128 = vector.broadcast %126 : vector<4x1xf32> to vector<4x256xf32>
    %129 = vector.broadcast %127 : vector<1x256xf32> to vector<4x256xf32>
    %130 = arith.mulf %128, %129 : vector<4x256xf32>
    %131 = arith.addf %125, %130 : vector<4x256xf32>
    %132 = vector.extract_strided_slice %5 {offsets = [0, 7], sizes = [4, 1], strides = [1, 1]} : vector<4x8xf32> to vector<4x1xf32>
    %133 = vector.extract_strided_slice %90 {offsets = [7, 0], sizes = [1, 256], strides = [1, 1]} : vector<8x256xf32> to vector<1x256xf32>
    %134 = vector.broadcast %132 : vector<4x1xf32> to vector<4x256xf32>
    %135 = vector.broadcast %133 : vector<1x256xf32> to vector<4x256xf32>
    %136 = arith.mulf %134, %135 : vector<4x256xf32>
    %137 = arith.addf %131, %136 : vector<4x256xf32>
    %138 = arith.mulf %137, %137 : vector<4x256xf32>
    %139 = vector.shape_cast %138 : vector<4x256xf32> to vector<1x4x256xf32>
    %cst_17 = arith.constant dense<0.000000e+00> : vector<1xf32>
    %140 = vector.multi_reduction <add>, %139, %cst_17 [1, 2] : vector<1x4x256xf32> to vector<1xf32>
    %141 = vector.shape_cast %140 : vector<1xf32> to vector<1x1x1xf32>
    %142 = vector.extract %141[0, 0, 0] : f32 from vector<1x1x1xf32>
    %143 = vector.broadcast %142 : f32 to vector<1x1xf32>
    %144 = math.sqrt %143 : vector<1x1xf32>
    %cst_18 = arith.constant 9.99999993E-9 : f32
    %145 = vector.broadcast %cst_18 : f32 to vector<1x1xf32>
    %146 = arith.addf %144, %145 : vector<1x1xf32>
    %147 = tpu.reciprocal %146 {approx = true} : vector<1x1xf32> -> vector<1x1xf32>
    %148 = vector.broadcast %147 : vector<1x1xf32> to vector<4x256xf32>
    %149 = arith.mulf %137, %148 : vector<4x256xf32>
    %cst_19 = arith.constant 1.000000e+01 : f32
    %150 = vector.broadcast %cst_19 : f32 to vector<4x256xf32>
    %151 = arith.mulf %150, %149 : vector<4x256xf32>
    %152 = arith.addf %1, %151 : vector<4x256xf32>
    %c0_20 = arith.constant 0 : index
    %c0_21 = arith.constant 0 : index
    %c0_22 = arith.constant 0 : index
    %153 = vector.load %arg6[%c0_20, %c0_21, %c0_22] : memref<1x4x256xf32, #tpu.memory_space<vmem>>, vector<1x4x256xf32>
    %154 = vector.shape_cast %153 : vector<1x4x256xf32> to vector<4x256xf32>
    %155 = vector.shape_cast %152 : vector<4x256xf32> to vector<1x4x256xf32>
    tpu.vector_store %arg6[%c0_20, %c0_21, %c0_22], %155 {strides = array<i32>} : memref<1x4x256xf32, #tpu.memory_space<vmem>>, vector<1x4x256xf32>,
    return
  }
  func.func @transform_0(%arg0: i32) -> (i32, i32, i32) {
    %c0_i32 = arith.constant 0 : i32
    %c0_i32_0 = arith.constant 0 : i32
    %c0_i32_1 = arith.constant 0 : i32
    return %arg0, %c0_i32, %c0_i32_0 : i32, i32, i32
  }
  func.func @transform_1(%arg0: i32) -> (i32, i32, i32) {
    %c0_i32 = arith.constant 0 : i32
    %c0_i32_0 = arith.constant 0 : i32
    %c0_i32_1 = arith.constant 0 : i32
    return %arg0, %c0_i32, %c0_i32_0 : i32, i32, i32
  }
  func.func @transform_2(%arg0: i32) -> (i32, i32) {
    %c0_i32 = arith.constant 0 : i32
    %c0_i32_0 = arith.constant 0 : i32
    %c0_i32_1 = arith.constant 0 : i32
    return %c0_i32, %c0_i32_0 : i32, i32
  }
  func.func @transform_3(%arg0: i32) -> (i32, i32) {
    %c0_i32 = arith.constant 0 : i32
    %c0_i32_0 = arith.constant 0 : i32
    %c0_i32_1 = arith.constant 0 : i32
    return %c0_i32, %c0_i32_0 : i32, i32
  }
  func.func @transform_4(%arg0: i32) -> (i32, i32) {
    %c0_i32 = arith.constant 0 : i32
    %c0_i32_0 = arith.constant 0 : i32
    %c0_i32_1 = arith.constant 0 : i32
    return %c0_i32, %c0_i32_0 : i32, i32
  }
  func.func @transform_5(%arg0: i32) -> (i32, i32, i32) {
    %c0_i32 = arith.constant 0 : i32
    %c0_i32_0 = arith.constant 0 : i32
    %c0_i32_1 = arith.constant 0 : i32
    return %arg0, %c0_i32, %c0_i32_0 : i32, i32, i32
  }
}

</mosaic_0001>

<bundles_post_ra>
// kernel: tpu_custom_call.1
= control target key start
LH: loop header
LB: loop body
LE: loop exit
PB: predicated region body
PF: predicated region fallthrough
CT: control target
= control target key end

     0   :  { %10 = vsyncpa [#allocation3], 0  ;;  %s1363_s0 = inlined_call_operand.vmem [shape: f32[2,4,256], index: 0, kind: input, shape index: {}]   ;;  %s1364_s1 = inlined_call_operand.hbm [shape: f32[2,4,256], index: 1, kind: input, shape index: {}]   ;;  %s1365_s2 = inlined_call_operand.vmem [shape: f32[8,4], index: 2, kind: input, shape index: {}]   ;;  %s1366_s3 = inlined_call_operand.vmem [shape: f32[4,8], index: 3, kind: input, shape index: {}]   ;;  %s1367_s4 = inlined_call_operand.vmem [shape: f32[8,1], index: 4, kind: input, shape index: {}]   ;;  %s1368_s5 = inlined_call_operand.hbm [shape: f32[2,4,256], index: 5, kind: output, shape index: {}]  }
   0x1   :  { %12 = vsyncpa [#allocation3 + $0x1], 0 }
   0x2   :  { %13 = vsyncpa [#allocation4], 0 }
   0x3   :  { %15 = vsyncpa [#allocation4 + $0x1], 0  ;;  %s1076_s18 = smov 0   ;;  %s1078_s19 = smov 0  }
   0x4   :  { %s1080_s20 = smov 0   ;;  %s1082_s21 = smov 0  }
   0x5 LB: > { %s1097_s22 = sadd.s32 4294967295, %s1034_s21   ;;  %s824_s23 = sadd.s32 4294967294, %s1034_s21   ;;  %s1034_s21 = sphi %s1082_s21, %s1383_s21   ;;  %s1030_s20 = sphi %s1080_s20, %s1382_s20   ;;  %s1026_s19 = sphi %s1078_s19, %s1381_s19   ;;  %s1022_s18 = sphi %s1076_s18, %s1380_s18  }
   0x6   : > { %s1101_s24 = sadd.s32 1, %s1034_s21   ;;  %s54_s25 = sadd.s32 1, %s1030_s20 }
   0x7   : > { %s51_s26 = ssub.s32 %s1034_s21, %s1101_s24  ;;  %p61_p0 = scmp.ne.s32.totalorder %s1030_s20, %s1026_s19 }
   0x8   : > { %p52_p1 = scmp.eq.s32.totalorder %s51_s26, 0  ;;  %p62_p2 = scmp.eq.s32.totalorder %s1034_s21, 0 }
   0x9   : > { %p67_p3 = scmp.ne.s32.totalorder %s1026_s19, %s1022_s18  ;;  %p68_p4 = scmp.eq.s32.totalorder %s1097_s22, 0 }
   0xa   : > { %s1113_s27 = scalar_select %p52_p1, %s1030_s20, %s54_s25  }
   0xb   : > { %p1115_p5 = por %p62_p2, %p61_p0  ;;  %p1119_p6 = por %p68_p4, %p67_p3 }
   0xc   : > { %p154_p7 = scmp.eq.s32.totalorder %s1097_s22, 1  ;;  %p160_p8 = scmp.eq.s32.totalorder %s824_s23, 1 }
   0xd   : > { %p859_p10 = scmp.lt.s32.totalorder %s1034_s21, 2  ;;  %s197_s7 = sand.u32 1, %s1030_s20  }
   0xe   : > { %p1126_p11 = por %p154_p7, %p61_p0  ;;  %p1130_p12 = por %p160_p8, %p67_p3 }
   0xf   : > { %s840_s8 = sshll.u32 %s1034_s21, 7  ;;  %s827_s9 = sshll.u32 %s197_s7, 3 }
  0x10   : > { %s1372_s30 = scalar_select %p1126_p11, 1, 0 }
  0x11   : > { %s1373_s6 = scalar_select %p1130_p12, 1, 0 }
  0x12   : > { %s1139_s12 = scalar_lea.hbm %s1364_s1, %s840_s8  ;;  %s201_s13 = scalar_lea.vmem [#allocation2], %s827_s9 }
  0x13   : > { %s209_s14 = sshll.u32 %s201_s13, 4  ;;  %p1143_p13 = pnand %p859_p10, %p1115_p5  ;;  %s1147_s14 = int_to_ptr.vmem [resolvable:$true] %s209_s14 }
  0x14   : > { %s198_s16 = scalar_lea.sflag [#allocation3], %s197_s7  ;;  %s938_s17 = scalar_lea.hbm %s1139_s12, 128 }
  0x15   : > { %p939_p2 = scmp.ne.s32.totalorder %s1139_s12, %s938_s17  ;;  %p940_p3 = pneg %p1143_p13 }
  0x16   : > { %s943_s26 = scalar_lea.hbm %s1364_s1, 256  ;;  %p944_p5 = scmp.lt.u32.totalorder %s1139_s12, %s1364_s1 }
  0x17   : > { %p941_p4 = pnand %p940_p3, %p939_p2  ;;  %p945_p8 = scmp.lt.u32.totalorder %s943_s26, %s938_s17 }
  0x18   : > { %p947_p9 = scmp.lt.u32.totalorder %s938_s17, %s1139_s12 }
  0x19   : > { %p942_p7 = pneg %p941_p4  ;;  %p946_p10 = por %p945_p8, %p944_p5 }
  0x1b   : > { %p948_p0 = por %p947_p9, %p946_p10 }
  0x1d   : > { %p949_p1 = pnand %p948_p0, %p942_p7 }
  0x1f   : > { %952 = shalt.err (!%p949_p1)
}
  0x20   : > { %s953_s7 = scalar_lea.vmem %s1147_s14, 128  ;;  %s1036_s9 = smov [#allocation2]  }
  0x21   : > { %p954_p2 = scmp.ne.s32.totalorder %s1147_s14, %s953_s7  ;;  %s958_s10 = sshll.u32 %s1036_s9, 4  ;;  %s959_s10 = int_to_ptr.vmem [resolvable:$false] %s958_s10 }
  0x22   : > { %s960_s11 = scalar_lea.vmem %s959_s10, 256  ;;  %p961_p11 = scmp.lt.s32.totalorder %s1147_s14, %s959_s10 }
  0x23   : > { %p956_p4 = pnand %p954_p2, %p940_p3  ;;  %p962_p5 = scmp.lt.s32.totalorder %s960_s11, %s953_s7 }
  0x25   : > { %p957_p12 = pneg %p956_p4  ;;  %p963_p8 = por %p962_p5, %p961_p11 }
  0x27   : > { %p964_p9 = pnand %p963_p8, %p957_p12 }
  0x29   : > { %967 = shalt.err (!%p964_p9)
}
  0x2a   : > { %854 = dma.hbm_to_vmem [thread:$0]  (!%p1143_p13), %s1139_s12, 128, %s1147_s14, %s198_s16  }
  0x2b   : > { %p1375_p0 = scmp.lt.s32.totalorder %s1034_s21, 3  ;;  %p1376_p1 = scmp.ge.s32.totalorder %s1034_s21, 1 }
  0x2d   : > { %p215_p3 = pnand %p1376_p1, %p1375_p0 }
  0x2e   : > { %s1181_s13 = sand.u32 (!%p215_p3), 1, %s1026_s19  }
  0x2f   : > { %218 = sbr.rel (%p215_p3) target bundleno = 647 (0x287), region = 40  ;;  %s831_s17 = sshll.u32 (!%p215_p3), %s1181_s13, 3 }
  0x30   : > { %s221_s23 = scalar_lea.sflag (!%p215_p3), [#allocation3], %s1181_s13  ;;  %s224_s15 = scalar_lea.vmem (!%p215_p3), [#allocation2], %s831_s17 }
  0x36   : > { %1013 = dma.done.wait (%p1119_p6), %s221_s23, 128  }
  0x37   : > { %1015 = vsyncadd (%p1119_p6), %s221_s23, 4294967168  ;;  %v1037_v0 = vmov 1   ;;  %v1038_v1 = vmov 0   ;;  %v1191_v2 = vld [vmem:[%s224_s15] sm:$0xff]  ;;  %vm415_vm0 = vcmask 1043456   ;;  %v1039_v8 = vmov 2  }
  0x38   : > { %902 = vset.pattern.permute.xlu1 %v1037_v0  ;;  %901 = vset.pattern.permute.xlu0 %v1038_v1  ;;  %v263_v3 = vld [vmem:[%s1365_s2] sm:$0xff]  ;;  %v411_v4 = vmul.f32 %v1191_v2, %v1191_v2  ;;  %v1040_v10 = vmov 3   ;;  %v1041_v13 = vmov 7   ;;  %v1042_v14 = vmov 4   ;;  %p256_p6 = scmp.lt.s32.totalorder %s1097_s22, 1  ;;  %s842_s15 = sshll.u32 %s1097_s22, 7 }
  0x39   : > { %293 = vperm.xlu1 %902, %v263_v3   ;;  %v265_v11 = vld [vmem:[%s1367_s4] sm:$0xff]  ;;  %v1043_v15 = vmov 5   ;;  %v1044_v16 = vmov 6   ;;  %v272_v24 = vlaneseq  ;;  %s255_s12 = scalar_lea.vmem [#allocation5], %s831_s17  ;;  %s1319_s25 = scalar_lea.hbm %s1368_s5, %s842_s15 }
  0x3a   : > { %v413_v5 = vcombine.high %v411_v4, %v411_v4  ;;  %v416_v6 = vsel %vm415_vm0, %v411_v4, 0.0  ;;  %v264_v12 = vld [vmem:[%s1366_s3] sm:$0xf]  ;;  %s257_s28 = scalar_select %p256_p6, %s1097_s22, 1 }
  0x3b   : > { %v273_v25 = vshrl.u32 %v272_v24, 7  ;;  %s742_s14 = sshll.u32 %s255_s12, 4  ;;  %s728_s26 = scalar_lea.sflag [#allocation4], %s1181_s13  ;;  %s1321_s14 = int_to_ptr.vmem [resolvable:$true] %s742_s14 }
  0x3c   : > { %v417_v7 = vsel %vm415_vm0, %v413_v5, 0.0  ;;  %s841_s8 = sshll.u32 %s257_s28, 3  ;;  %s968_s28 = scalar_lea.vmem %s1321_s14, 128 }
  0x3d   : > { %903 = vset.pattern.permute.xlu1 %v1039_v8  ;;  %v418_v9 = vadd.f32 %v417_v7, %v416_v6  ;;  %s260_s10 = scalar_lea.vmem %s1363_s0, %s841_s8  ;;  %v1211_v26 = vsub.s32 1, %v273_v25  ;;  %v1213_v27 = vsub.s32 0, %v273_v25  ;;  %v1217_v29 = vsub.s32 5, %v273_v25  ;;  %p969_p11 = scmp.ne.s32.totalorder %s1321_s14, %s968_s28 }
  0x3e   : > { %319 = vperm.xlu1 %903, %v263_v3   ;;  %v1215_v28 = vld [vmem:[%s260_s10] sm:$0xff]  ;;  %v1221_v31 = vsub.s32 2, %v273_v25  ;;  %v1223_v32 = vsub.s32 4, %v273_v25  ;;  %v1231_v36 = vsub.s32 6, %v273_v25  ;;  %v1233_v37 = vsub.s32 3, %v273_v25  ;;  %p1377_p12 = scmp.ne.s32.totalorder %s1372_s30, 0 }
  0x3f   : > { %419 = vadd.xlane.f32.xlu0 %v418_v9  ;;  %v299_v30 = vrot.slane %v1215_v28, %v1211_v26  ;;  %v275_v33 = vrot.slane %v1215_v28, %v1213_v27  ;;  %v303_v35 = vrot.slane %v1215_v28, %v1217_v29  ;;  %v1248_v46 = vsub.s32 7, %v273_v25  ;;  %s1045_s22 = smov [#allocation5]  }
  0x40   : > { %v325_v39 = vrot.slane %v1215_v28, %v1221_v31  ;;  %v279_v40 = vrot.slane %v1215_v28, %v1223_v32  ;;  %v329_v45 = vrot.slane %v1215_v28, %v1231_v36  ;;  %v351_v47 = vrot.slane %v1215_v28, %v1233_v37  ;;  %p970_p13 = pnand %p969_p11, %p1377_p12  ;;  %s972_s17 = sshll.u32 %s1045_s22, 4  ;;  %s973_s17 = int_to_ptr.vmem [resolvable:$false] %s972_s17 }
  0x41   : > { %v309_v38 = vrot.slane %v299_v30, %v1211_v26  ;;  %v285_v41 = vrot.slane %v275_v33, %v1213_v27  ;;  %v313_v43 = vrot.slane %v303_v35, %v1211_v26  ;;  %v355_v53 = vrot.slane %v1215_v28, %v1248_v46  ;;  %s974_s8 = scalar_lea.vmem %s973_s17, 256  ;;  %p975_p10 = scmp.lt.s32.totalorder %s1321_s14, %s973_s17 }
  0x42   : > { %904 = vset.pattern.permute.xlu1 %v1040_v10  ;;  %v335_v49 = vrot.slane %v325_v39, %v1221_v31  ;;  %v289_v50 = vrot.slane %v279_v40, %v1213_v27  ;;  %v339_v52 = vrot.slane %v329_v45, %v1221_v31  ;;  %v361_v54 = vrot.slane %v351_v47, %v1233_v37  ;;  %p971_p7 = pneg %p970_p13  ;;  %p976_p2 = scmp.lt.s32.totalorder %s974_s8, %s968_s28 }
  0x43   : > { %345 = vperm.xlu1 %904, %v263_v3   ;;  %v365_v60 = vrot.slane %v355_v53, %v1233_v37 }
  0x44   : > { %p977_p4 = por %p976_p2, %p975_p10 }
  0x46   : > { %p978_p5 = pnand %p977_p4, %p971_p7 }
  0x47   : > { %905 = vset.pattern.permute.xlu1 %v1038_v1 }
  0x48   : > { %372 = vperm.xlu1 %905, %v265_v11  }
  0x4c   : > { %568 = vperm.xlu1 %905, %v264_v12  }
  0x50   : > { %906 = vset.pattern.permute.xlu1 %v1037_v0 }
  0x51   : > { %582 = vperm.xlu1 %906, %v264_v12  }
  0x55   : > { %907 = vset.pattern.permute.xlu1 %v1039_v8  ;;  %268 = vperm.xlu0 %901, %v263_v3  }
  0x56   : > { %598 = vperm.xlu1 %907, %v264_v12  }
  0x59   : > { %913 = vset.pattern.permute.xlu0 %v1041_v13 }
  0x5a   : > { %908 = vset.pattern.permute.xlu1 %v1040_v10 }
  0x5b   : > { %614 = vperm.xlu1 %908, %v264_v12  }
  0x5f   : > { %909 = vset.pattern.permute.xlu1 %v1042_v14 }
  0x60   : > { %630 = vperm.xlu1 %909, %v264_v12  }
  0x64   : > { %910 = vset.pattern.permute.xlu1 %v1043_v15 }
  0x65   : > { %646 = vperm.xlu1 %910, %v264_v12  }
  0x69   : > { %911 = vset.pattern.permute.xlu1 %v1044_v16 }
  0x6a   : > { %662 = vperm.xlu1 %911, %v264_v12  }
  0x6e   : > { %912 = vset.pattern.permute.xlu1 %v1041_v13 }
  0x6f   : > { %678 = vperm.xlu1 %912, %v264_v12  }
  0xb8   : > { %v1227_v34 = vpop.permute.xlu1 %293 }
  0xb9   : > { %v314_v48 = vmul.f32 %v309_v38, %v1227_v34  ;;  %v315_v55 = vmul.f32 %v313_v43, %v1227_v34 }
  0xbd   : > { %v1244_v44 = vpop.permute.xlu1 %319 }
  0xbe   : > { %v340_v56 = vmul.f32 %v335_v49, %v1244_v44  ;;  %v341_v61 = vmul.f32 %v339_v52, %v1244_v44 }
  0xc2   : > { %v1263_v59 = vpop.permute.xlu1 %345 }
  0xc3   : > { %v366_v0 = vmul.f32 %v361_v54, %v1263_v59  ;;  %v367_v4 = vmul.f32 %v365_v60, %v1263_v59 }
  0xc7   : > { %v373_v6 = vpop.permute.xlu1 %372 }
  0xcc   : > { %v420_v17 = vpop.xlane.xlu0 %419 }
  0xcd   : > { %v421_v18 = vrot.slane %v420_v17, 4 }
  0xcf   : > { %v422_v19 = vadd.f32 %v421_v18, %v420_v17 }
  0xd1   : > { %v423_v20 = vrot.slane %v422_v19, 2 }
  0xd3   : > { %v424_v21 = vadd.f32 %v423_v20, %v422_v19 }
  0xd4   : > { %v1241_v42 = vpop.permute.xlu0 %268 }
  0xd5   : > { %v425_v22 = vrot.slane %v424_v21, 1  ;;  %v290_v51 = vmul.f32 %v285_v41, %v1241_v42  ;;  %v291_v57 = vmul.f32 %v289_v50, %v1241_v42 }
  0xd7   : > { %v426_v23 = vadd.f32 %v425_v22, %v424_v21  ;;  %v316_v58 = vadd.f32 %v314_v48, %v290_v51  ;;  %v317_v62 = vadd.f32 %v315_v55, %v291_v57 }
  0xd9   : > { %843 = vpush %v426_v23  ;;  %v342_v63 = vadd.f32 %v340_v56, %v316_v58  ;;  %v343_v3 = vadd.f32 %v341_v61, %v317_v62 }
  0xdb   : > { %v368_v5 = vadd.f32 %v366_v0, %v342_v63  ;;  %v369_v7 = vadd.f32 %v367_v4, %v343_v3 }
  0xdd   : > { %v375_v8 = vadd.f32 %v373_v6, %v368_v5  ;;  %v376_v9 = vadd.f32 %v373_v6, %v369_v7 }
  0xdf   : > { %v377_v10 = vrot.slane %v375_v8, 4  ;;  %v383_v16 = vrot.slane %v376_v9, 4 }
  0xe1   : > { %v378_v15 = vmax.f32 %v375_v8, %v377_v10  ;;  %v384_v20 = vmax.f32 %v376_v9, %v383_v16 }
  0xe3   : > { %v379_v19 = vrot.slane %v378_v15, 2  ;;  %v385_v22 = vrot.slane %v384_v20, 2 }
  0xe5   : > { %v380_v21 = vmax.f32 %v378_v15, %v379_v19  ;;  %v386_v24 = vmax.f32 %v384_v20, %v385_v22 }
  0xe7   : > { %v381_v23 = vrot.slane %v380_v21, 1  ;;  %v387_v35 = vrot.slane %v386_v24, 1 }
  0xe9   : > { %v382_v33 = vmax.f32 %v380_v21, %v381_v23  ;;  %v388_v61 = vmax.f32 %v386_v24, %v387_v35 }
  0xeb   : > { %v389_v3 = vsub.f32 %v375_v8, %v382_v33  ;;  %v390_v10 = vsub.f32 %v376_v9, %v388_v61 }
 0x10a   : > { %s844_s11 = spop %843 }
 0x10b   : > { %v428_v1 = vstv %s844_s11 }
 0x10c   : > { %914 = vrsqrt.f32 %v428_v1  ;;  %vm431_vm1 = vcmp.eq.f32.partialorder %v428_v1, inf  ;;  %v434_v13 = vand.u32 2147483648, %v428_v1  ;;  %vm433_vm2 = vcmp.eq.f32.partialorder %v428_v1, 0.0 }
 0x116   : > { %v915_v11 = vpop.eup %914 }
 0x117   : > { %v430_v12 = vmul.f32 %v915_v11, %v428_v1 }
 0x119   : > { %v432_v14 = vsel %vm431_vm1, %v428_v1, %v430_v12  ;;  %v391_v12 = vmul.f32 1.442695, %v389_v3 }
 0x11a   : > { %v435_v17 = vsel %vm433_vm2, %v434_v13, %v432_v14  ;;  %v393_v14 = vmul.f32 1.442695, %v390_v10 }
 0x11b   : > { %v436_v18 = vadd.f32 1e-08, %v435_v17 }
 0x11d   : > { %916 = vrcp.f32 %v436_v18 }
 0x11e   : > { %918 = vpow2.f32 %v391_v12 }
 0x11f   : > { %920 = vpow2.f32 %v393_v14 }
 0x127   : > { %v917_v25 = vpop.eup %916 }
 0x128   : > { %v438_v30 = vmul.f32 %v917_v25, %v1191_v2  ;;  %v919_v25 = vpop.eup %918 }
 0x129   : > { %v921_v35 = vpop.eup %920 }
 0x12a   : > { %v443_v38 = vrot.slane %v438_v30, %v1213_v27  ;;  %v447_v39 = vrot.slane %v438_v30, %v1223_v32  ;;  %v463_v40 = vrot.slane %v438_v30, %v1211_v26  ;;  %v467_v41 = vrot.slane %v438_v30, %v1217_v29 }
 0x12b   : > { %v485_v43 = vrot.slane %v438_v30, %v1221_v31  ;;  %v489_v45 = vrot.slane %v438_v30, %v1231_v36  ;;  %v507_v47 = vrot.slane %v438_v30, %v1233_v37  ;;  %v511_v48 = vrot.slane %v438_v30, %v1248_v46 }
 0x12c   : > { %v453_v2 = vrot.slane %v443_v38, %v1213_v27  ;;  %v457_v49 = vrot.slane %v447_v39, %v1213_v27  ;;  %v473_v50 = vrot.slane %v463_v40, %v1211_v26  ;;  %v477_v51 = vrot.slane %v467_v41, %v1211_v26 }
 0x12d   : > { %v495_v52 = vrot.slane %v485_v43, %v1221_v31  ;;  %v499_v53 = vrot.slane %v489_v45, %v1221_v31  ;;  %v517_v54 = vrot.slane %v507_v47, %v1233_v37  ;;  %v521_v55 = vrot.slane %v511_v48, %v1233_v37 }
 0x12e   : > { %v458_v56 = vmul.f32 %v453_v2, %v1241_v42  ;;  %v459_v57 = vmul.f32 %v457_v49, %v1241_v42  ;;  %v478_v58 = vmul.f32 %v473_v50, %v1227_v34  ;;  %v479_v60 = vmul.f32 %v477_v51, %v1227_v34  ;;  %v569_v49 = vpop.permute.xlu1 %568 }
 0x12f   : > { %v500_v0 = vmul.f32 %v495_v52, %v1244_v44  ;;  %v501_v1 = vmul.f32 %v499_v53, %v1244_v44  ;;  %v522_v6 = vmul.f32 %v517_v54, %v1263_v59  ;;  %v523_v7 = vmul.f32 %v521_v55, %v1263_v59 }
 0x130   : > { %v480_v62 = vadd.f32 %v478_v58, %v458_v56  ;;  %v481_v63 = vadd.f32 %v479_v60, %v459_v57 }
 0x132   : > { %v502_v4 = vadd.f32 %v500_v0, %v480_v62  ;;  %v503_v5 = vadd.f32 %v501_v1, %v481_v63  ;;  %v583_v57 = vpop.permute.xlu1 %582 }
 0x134   : > { %v524_v42 = vadd.f32 %v522_v6, %v502_v4  ;;  %v525_v11 = vadd.f32 %v523_v7, %v503_v5 }
 0x136   : > { %v526_v13 = vmul.f32 0.1, %v524_v42  ;;  %v527_v34 = vmul.f32 0.1, %v525_v11  ;;  %v599_v5 = vpop.permute.xlu1 %598 }
 0x138   : > { %v528_v15 = vadd.f32 %v526_v13, %v375_v8  ;;  %v529_v16 = vadd.f32 %v527_v34, %v376_v9  ;;  %v395_v8 = vrot.slane %v919_v25, 4  ;;  %v401_v9 = vrot.slane %v921_v35, 4 }
 0x13a   : > { %v530_v17 = vrot.slane %v528_v15, 4  ;;  %v536_v18 = vrot.slane %v529_v16, 4  ;;  %v396_v43 = vadd.f32 %v919_v25, %v395_v8  ;;  %v402_v45 = vadd.f32 %v921_v35, %v401_v9  ;;  %v615_v42 = vpop.permute.xlu1 %614 }
 0x13c   : > { %v531_v44 = vmax.f32 %v528_v15, %v530_v17  ;;  %v537_v19 = vmax.f32 %v529_v16, %v536_v18  ;;  %v397_v47 = vrot.slane %v396_v43, 2  ;;  %v403_v48 = vrot.slane %v402_v45, 2 }
 0x13e   : > { %v532_v20 = vrot.slane %v531_v44, 2  ;;  %v538_v21 = vrot.slane %v537_v19, 2  ;;  %v398_v2 = vadd.f32 %v397_v47, %v396_v43  ;;  %v404_v51 = vadd.f32 %v403_v48, %v402_v45  ;;  %v631_v12 = vpop.permute.xlu1 %630 }
 0x140   : > { %v533_v22 = vmax.f32 %v531_v44, %v532_v20  ;;  %v539_v23 = vmax.f32 %v537_v19, %v538_v21  ;;  %v399_v55 = vrot.slane %v398_v2, 1  ;;  %v405_v58 = vrot.slane %v404_v51, 1 }
 0x142   : > { %v534_v59 = vrot.slane %v533_v22, 1  ;;  %v540_v24 = vrot.slane %v539_v23, 1  ;;  %v400_v63 = vadd.f32 %v399_v55, %v398_v2  ;;  %v406_v1 = vadd.f32 %v405_v58, %v404_v51  ;;  %v647_v20 = vpop.permute.xlu1 %646 }
 0x144   : > { %v535_v30 = vmax.f32 %v533_v22, %v534_v59  ;;  %v541_v33 = vmax.f32 %v539_v23, %v540_v24 }
 0x146   : > { %v542_v38 = vsub.f32 %v528_v15, %v535_v30  ;;  %v543_v39 = vsub.f32 %v529_v16, %v541_v33  ;;  %v663_v47 = vpop.permute.xlu1 %662 }
 0x148   : > { %v544_v40 = vmul.f32 1.442695, %v542_v38  ;;  %v546_v41 = vmul.f32 1.442695, %v543_v39 }
 0x14a   : > { %922 = vpow2.f32 %v544_v40 }
 0x14b   : > { %924 = vpow2.f32 %v546_v41 }
 0x14c   : > { %926 = vrcp.f32 %v400_v63 }
 0x14d   : > { %928 = vrcp.f32 %v406_v1 }
 0x154   : > { %v923_v50 = vpop.eup %922 }
 0x155   : > { %v925_v52 = vpop.eup %924  ;;  %v548_v53 = vrot.slane %v923_v50, 4 }
 0x156   : > { %v554_v54 = vrot.slane %v925_v52, 4  ;;  %v927_v11 = vpop.eup %926 }
 0x157   : > { %v549_v56 = vadd.f32 %v923_v50, %v548_v53  ;;  %v929_v13 = vpop.eup %928  ;;  %v409_v15 = vmul.f32 %v927_v11, %v919_v25 }
 0x158   : > { %v555_v60 = vadd.f32 %v925_v52, %v554_v54  ;;  %v410_v17 = vmul.f32 %v929_v13, %v921_v35 }
 0x159   : > { %v550_v61 = vrot.slane %v549_v56, 2 }
 0x15a   : > { %v556_v62 = vrot.slane %v555_v60, 2 }
 0x15b   : > { %v551_v0 = vadd.f32 %v550_v61, %v549_v56  ;;  %v679_v61 = vpop.permute.xlu1 %678 }
 0x15c   : > { %v557_v3 = vadd.f32 %v556_v62, %v555_v60 }
 0x15d   : > { %v552_v4 = vrot.slane %v551_v0, 1 }
 0x15e   : > { %v558_v6 = vrot.slane %v557_v3, 1 }
 0x15f   : > { %v553_v7 = vadd.f32 %v552_v4, %v551_v0 }
 0x160   : > { %v559_v10 = vadd.f32 %v558_v6, %v557_v3 }
 0x161   : > { %930 = vrcp.f32 %v553_v7 }
 0x162   : > { %932 = vrcp.f32 %v559_v10 }
 0x16b   : > { %v931_v34 = vpop.eup %930 }
 0x16c   : > { %v933_v14 = vpop.eup %932  ;;  %v562_v16 = vmul.f32 %v931_v34, %v923_v50 }
 0x16d   : > { %v563_v18 = vmul.f32 %v933_v14, %v925_v52 }
 0x16e   : > { %v564_v44 = vsub.f32 %v562_v16, %v409_v15 }
 0x16f   : > { %v565_v19 = vsub.f32 %v563_v18, %v410_v17 }
 0x170   : > { %v574_v21 = vrot.slane %v564_v44, %v1213_v27  ;;  %v588_v22 = vrot.slane %v564_v44, %v1211_v26  ;;  %v604_v23 = vrot.slane %v564_v44, %v1221_v31  ;;  %v620_v35 = vrot.slane %v564_v44, %v1233_v37 }
 0x171   : > { %v578_v59 = vrot.slane %v565_v19, %v1213_v27  ;;  %v592_v24 = vrot.slane %v565_v19, %v1211_v26  ;;  %v608_v30 = vrot.slane %v565_v19, %v1221_v31  ;;  %v624_v8 = vrot.slane %v565_v19, %v1233_v37 }
 0x172   : > { %v579_v33 = vmul.f32 %v574_v21, %v569_v49  ;;  %v593_v25 = vmul.f32 %v588_v22, %v583_v57  ;;  %v609_v40 = vmul.f32 %v604_v23, %v599_v5  ;;  %v636_v41 = vrot.slane %v564_v44, %v1223_v32 }
 0x173   : > { %v580_v38 = vmul.f32 %v578_v59, %v569_v49  ;;  %v594_v39 = vmul.f32 %v592_v24, %v583_v57  ;;  %v610_v45 = vmul.f32 %v608_v30, %v599_v5  ;;  %v640_v27 = vrot.slane %v565_v19, %v1223_v32 }
 0x174   : > { %v595_v9 = vadd.f32 %v593_v25, %v579_v33  ;;  %v625_v48 = vmul.f32 %v620_v35, %v615_v42  ;;  %v652_v31 = vrot.slane %v564_v44, %v1217_v29  ;;  %v626_v50 = vmul.f32 %v624_v8, %v615_v42 }
 0x175   : > { %v596_v43 = vadd.f32 %v594_v39, %v580_v38  ;;  %v656_v49 = vrot.slane %v565_v19, %v1217_v29  ;;  %v641_v52 = vmul.f32 %v636_v41, %v631_v12  ;;  %v668_v37 = vrot.slane %v564_v44, %v1231_v36 }
 0x176   : > { %v611_v26 = vadd.f32 %v609_v40, %v595_v9  ;;  %v642_v54 = vmul.f32 %v640_v27, %v631_v12  ;;  %v672_v55 = vrot.slane %v565_v19, %v1231_v36  ;;  %v657_v57 = vmul.f32 %v652_v31, %v647_v20 }
 0x177   : > { %v612_v2 = vadd.f32 %v610_v45, %v596_v43  ;;  %v684_v32 = vrot.slane %v564_v44, %v1248_v46  ;;  %v658_v60 = vmul.f32 %v656_v49, %v647_v20  ;;  %v688_v62 = vrot.slane %v565_v19, %v1248_v46 }
 0x178   : > { %v627_v51 = vadd.f32 %v625_v48, %v611_v26  ;;  %v673_v0 = vmul.f32 %v668_v37, %v663_v47  ;;  %v674_v1 = vmul.f32 %v672_v55, %v663_v47 }
 0x179   : > { %v628_v53 = vadd.f32 %v626_v50, %v612_v2  ;;  %v689_v4 = vmul.f32 %v684_v32, %v679_v61  ;;  %v690_v6 = vmul.f32 %v688_v62, %v679_v61 }
 0x17a   : > { %v643_v56 = vadd.f32 %v641_v52, %v627_v51 }
 0x17b   : > { %v644_v58 = vadd.f32 %v642_v54, %v628_v53 }
 0x17c   : > { %v659_v63 = vadd.f32 %v657_v57, %v643_v56 }
 0x17d   : > { %v660_v29 = vadd.f32 %v658_v60, %v644_v58 }
 0x17e   : > { %v675_v3 = vadd.f32 %v673_v0, %v659_v63 }
 0x17f   : > { %v676_v5 = vadd.f32 %v674_v1, %v660_v29 }
 0x180   : > { %v691_v7 = vadd.f32 %v689_v4, %v675_v3 }
 0x181   : > { %v692_v10 = vadd.f32 %v690_v6, %v676_v5 }
 0x182   : > { %v693_v36 = vmul.f32 %v691_v7, %v691_v7 }
 0x183   : > { %v694_v42 = vmul.f32 %v692_v10, %v692_v10 }
 0x184   : > { %v695_v11 = vsel %vm415_vm0, %v693_v36, 0.0 }
 0x185   : > { %v696_v12 = vsel %vm415_vm0, %v694_v42, 0.0 }
 0x186   : > { %v697_v13 = vadd.f32 %v696_v12, %v695_v11 }
 0x188   : > { %698 = vadd.xlane.f32.xlu0 %v697_v13 }
 0x215   : > { %v699_v34 = vpop.xlane.xlu0 %698 }
 0x216   : > { %v700_v46 = vrot.slane %v699_v34, 4 }
 0x218   : > { %v701_v14 = vadd.f32 %v700_v46, %v699_v34 }
 0x21a   : > { %v702_v15 = vrot.slane %v701_v14, 2 }
 0x21c   : > { %v703_v16 = vadd.f32 %v702_v15, %v701_v14 }
 0x21e   : > { %v704_v17 = vrot.slane %v703_v16, 1 }
 0x220   : > { %v705_v18 = vadd.f32 %v704_v17, %v703_v16 }
 0x222   : > { %845 = vpush %v705_v18 }
 0x253   : > { %s846_s23 = spop %845 }
 0x254   : > { %v707_v44 = vstv %s846_s23 }
 0x255   : > { %934 = vrsqrt.f32 %v707_v44  ;;  %vm710_vm3 = vcmp.eq.f32.partialorder %v707_v44, inf  ;;  %v713_v21 = vand.u32 2147483648, %v707_v44  ;;  %vm712_vm4 = vcmp.eq.f32.partialorder %v707_v44, 0.0 }
 0x25f   : > { %v935_v19 = vpop.eup %934 }
 0x260   : > { %v709_v20 = vmul.f32 %v935_v19, %v707_v44 }
 0x262   : > { %v711_v22 = vsel %vm710_vm3, %v707_v44, %v709_v20 }
 0x263   : > { %v714_v23 = vsel %vm712_vm4, %v713_v21, %v711_v22 }
 0x264   : > { %v715_v59 = vadd.f32 1e-08, %v714_v23 }
 0x266   : > { %936 = vrcp.f32 %v715_v59 }
 0x270   : > { %v937_v24 = vpop.eup %936 }
 0x271   : > { %v717_v30 = vmul.f32 %v937_v24, %v691_v7  ;;  %v718_v33 = vmul.f32 %v937_v24, %v692_v10 }
 0x273   : > { %v719_v25 = vmul.f32 10.0, %v717_v30  ;;  %v720_v35 = vmul.f32 10.0, %v718_v33 }
 0x275   : > { %v723_v38 = vcombine.low %v719_v25, %v720_v35 }
 0x277   : > { %v725_v39 = vadd.f32 %v723_v38, %v1215_v28 }
 0x279   : > { %726 = vst [vmem:[%s255_s12] sm:$0xff] %v725_v39 }
 0x27a   : > { %981 = shalt.err (!%p978_p5)
}
 0x27b   : > { %s982_s13 = scalar_lea.hbm %s1319_s25, 128  ;;  %s986_s10 = scalar_lea.hbm %s1368_s5, 256 }
 0x27c   : > { %p983_p8 = scmp.ne.s32.totalorder %s1319_s25, %s982_s13  ;;  %p987_p1 = scmp.lt.u32.totalorder %s1319_s25, %s1368_s5 }
 0x27d   : > { %p988_p3 = scmp.lt.u32.totalorder %s986_s10, %s982_s13  ;;  %p990_p11 = scmp.lt.u32.totalorder %s982_s13, %s1319_s25 }
 0x27e   : > { %p984_p9 = pnand %p983_p8, %p1377_p12 }
 0x27f   : > { %p989_p6 = por %p988_p3, %p987_p1 }
 0x280   : > { %p985_p0 = pneg %p984_p9 }
 0x281   : > { %p991_p13 = por %p990_p11, %p989_p6 }
 0x283   : > { %p992_p7 = pnand %p991_p13, %p985_p0 }
 0x285   : > { %995 = shalt.err (!%p992_p7)
}
 0x286   : > { %849 = dma.vmem_to_hbm [thread:$0]  (%p1377_p12), %s1321_s14, 128, %s1319_s25, %s728_s26  }
 0x287 PF: > { %s754_s15 = sand.u32 1, %s1022_s18   ;;  %p1378_p10 = scmp.ne.s32.totalorder %s1373_s6, 0 }
 0x288   : > { %p1379_p2 = scmp.ge.s32.totalorder %s1034_s21, 2  ;;  %s755_s12 = scalar_lea.sflag [#allocation4], %s754_s15 }
 0x28a   : > { %p856_p4 = pnand %p1379_p2, %p1378_p10 }
 0x28c   : > { %1017 = dma.done.wait (!%p856_p4), %s755_s12, 128  }
 0x28d   : > { %1019 = vsyncadd (!%p856_p4), %s755_s12, 4294967168  ;;  %p18_p5 = scmp.ge.s32.totalorder %s1101_s24, 4   ;;  %s1380_s18 = smov %s1026_s19 }
 0x28e   : > { %s1381_s19 = smov %s1030_s20  ;;  %s1382_s20 = smov %s1113_s27 }
 0x28f   : > { %s1383_s21 = smov %s1101_s24  ;;  %20 = sbr.rel (!%p18_p5) target bundleno = 5 (0x5), region = 88 }
 0x296   :  { %760 = vsyncpa [#allocation3], 1 }
 0x297   :  { %762 = vsyncpa [#allocation3 + $0x1], 1 }
 0x298   :  { %763 = vsyncpa [#allocation4], 1 }
 0x299   :  { %765 = vsyncpa [#allocation4 + $0x1], 1 }

</bundles_post_ra>
